<compile_context>
chip_gen: v5e
topology: v5e:2x2
jax: 0.10.0
libtpu: 0.0.40
codegen_flags: <defaults>
</compile_context>

<pallas_src>
import math
import jax
import jax.numpy as jnp
from jax.experimental import pallas as pl
from jax.experimental.pallas import tpu as pltpu


def _round_up(x, m):
    return ((x + m - 1) // m) * m


def _span_extractor_kernel(seq_ref, e_ref, starts_ref, ends_ref, out_ref):
    # Grid = (batch, d-block, span-block); span is innermost, so the sequence
    # tile (whose index map is span-independent) stays VMEM-resident for the
    # whole span loop and is DMA'd from HBM only once per (batch, d-block).
    e = e_ref[0]                        # (1, T_pad) f32, exp(w.x - max) per position
    starts = starts_ref[0]              # (S_blk, 1) int32
    ends = ends_ref[0]                  # (S_blk, 1) int32
    s_blk = starts.shape[0]
    t_pad = e.shape[-1]

    # token t belongs to span s iff start_s <= t <= end_s
    t_iota = jax.lax.broadcasted_iota(jnp.int32, (s_blk, t_pad), 1)
    in_span = (t_iota >= starts) & (t_iota <= ends)

    # Unnormalized weights; out-of-span / T-padded positions contribute exactly
    # 0 (matches the reference's -1000 fill underflowing in f32).
    p = jnp.where(in_span, jnp.broadcast_to(e, (s_blk, t_pad)), 0.0)   # f32
    p_mm = p.astype(seq_ref.dtype)      # bf16 on the fast path (MXU LHS operand)

    # Row sums from the *same* values the MXU will consume, so normalized
    # weights sum to 1 w.r.t. the actual operands (bf16 or f32).
    denom = jnp.sum(p_mm.astype(jnp.float32), axis=-1, keepdims=True)  # (S_blk, 1)
    safe = jnp.where(denom > 0.0, denom, 1.0)   # guard degenerate / padded spans
    r = pl.reciprocal(safe, approx=True)        # EUP slot, effectively free
    r = r * (2.0 - safe * r)                    # one Newton step on (S_blk, 1)

    # (S_blk, T_pad) @ (T_pad, D_blk) on the MXU; normalize after the matmul.
    attended = jnp.dot(p_mm, seq_ref[0], preferred_element_type=jnp.float32)
    out_ref[0] = (attended * r).astype(out_ref.dtype)


def self_attentive_span_extractor(sequence, span_indices, weight, bias,
                                  sequence_mask=None, span_indices_mask=None,
                                  matmul_dtype=jnp.bfloat16):
    """Forward pass of SelfAttentiveSpanExtractor.

    sequence:     (B, T, D) float
    span_indices: (B, S, 2) int, inclusive [start, end]
    weight:       (1, D)  -- Linear(D, 1) weight
    bias:         (1,)    -- Linear(D, 1) bias (softmax no-op, accepted for API parity)
    matmul_dtype: dtype of the MXU operands (bfloat16 default; f32 for exactness).
    Returns (B, S, D) in sequence.dtype.
    """
    B, T, D = sequence.shape
    S = span_indices.shape[1]
    mm_dtype = jnp.dtype(matmul_dtype)
    use_bf16 = mm_dtype == jnp.dtype(jnp.bfloat16)
    out_dtype = sequence.dtype
    mm_bytes = mm_dtype.itemsize
    out_bytes = jnp.dtype(out_dtype).itemsize

    # --- Hoisted attention scores: one dense matmul + exp, all in XLA. -------
    # bias shifts every logit equally and is therefore a softmax no-op; the
    # global max-subtraction keeps exp() in range.  Global (per-batch) max
    # rather than per-span max: mathematically identical unless a span's best
    # in-span logit sits ~88 below the batch max, in which case f32 underflow
    # zeroes the span (guarded in the kernel).
    # TODO(synk): per-span max stabilization if logit dynamic range is that large.
    logits = jnp.einsum("btd,d->bt", sequence, weight.reshape(-1),
                        preferred_element_type=jnp.float32)           # (B, T) f32
    e = jnp.exp(logits - jnp.max(logits, axis=-1, keepdims=True))     # (B, T) f32

    # --- Lane/sublane-aligned padding & VMEM-aware tiling. -------------------
    s_mult = 16 if use_bf16 else 8
    S_blk = min(256, _round_up(S, s_mult))
    S_pad = _round_up(S, S_blk)
    T_pad = _round_up(T, 128)
    D_pad128 = _round_up(D, 128)

    try:
        vmem_cap = int(pltpu.get_tpu_info().vmem_capacity_bytes)
    except Exception:
        vmem_cap = 64 * 1024 * 1024     # conservative fallback (v7x per-core VMEM)

    def _footprint(d_blk):
        return (2 * T_pad * d_blk * mm_bytes          # sequence tile (dbl-buffered)
                + 2 * S_blk * d_blk * out_bytes       # output tile (dbl-buffered)
                + 2 * T_pad * 4 + 4 * S_blk * 4       # exp'd scores + starts/ends
                + S_blk * T_pad * (4 + mm_bytes)      # in-kernel weight temporaries
                + (64 << 10))                         # headroom

    budget = min(vmem_cap // 2, 48 << 20)             # never assume all of VMEM
    D_blk = 128
    for cand in (2048, 1024, 512, 256, 128):
        c = min(cand, D_pad128)
        if _footprint(c) <= budget:
            D_blk = c
            break
    D_pad = _round_up(D, D_blk)
    # TODO(synk): add T (K-axis) tiling with an f32 accumulator for very long
    # sequences on 64 MiB-VMEM parts; the full padded T is held resident here.

    if T_pad == T and D_pad == D and sequence.dtype == mm_dtype:
        seq_p = sequence                               # no extra HBM round trip
    else:
        seq_p = jnp.pad(sequence, ((0, 0), (0, T_pad - T),
                                   (0, D_pad - D))).astype(mm_dtype)
    e_p = jnp.pad(e, ((0, 0), (0, T_pad - T)))[:, None, :]   # (B, 1, T_pad) f32

    starts = span_indices[..., 0].astype(jnp.int32)
    ends = span_indices[..., 1].astype(jnp.int32)
    # Padded spans become [0, 0]: valid single-token spans, sliced off below.
    starts = jnp.pad(starts, ((0, 0), (0, S_pad - S)))[..., None]     # (B, S_pad, 1)
    ends = jnp.pad(ends, ((0, 0), (0, S_pad - S)))[..., None]         # (B, S_pad, 1)

    n_s = S_pad // S_blk
    n_d = D_pad // D_blk
    grid = (B, n_d, n_s)

    est = _footprint(D_blk)
    vmem_limit = None
    if est > (12 << 20):
        vmem_limit = int(min(48 << 20, (3 * vmem_cap) // 4, 2 * est))

    out = pl.pallas_call(
        _span_extractor_kernel,
        out_shape=jax.ShapeDtypeStruct((B, S_pad, D_pad), out_dtype),
        grid=grid,
        in_specs=[
            # Sequence tile: index map is span-independent -> fetched once per
            # (batch, d-block), reused across the entire inner span loop.
            pl.BlockSpec((1, T_pad, D_blk), lambda b, d, s: (b, 0, d)),
            pl.BlockSpec((1, 1, T_pad), lambda b, d, s: (b, 0, 0)),   # exp'd scores
            pl.BlockSpec((1, S_blk, 1), lambda b, d, s: (b, s, 0)),   # span starts
            pl.BlockSpec((1, S_blk, 1), lambda b, d, s: (b, s, 0)),   # span ends
        ],
        out_specs=pl.BlockSpec((1, S_blk, D_blk), lambda b, d, s: (b, s, d)),
        compiler_params=pltpu.CompilerParams(
            dimension_semantics=("parallel", "parallel", "arbitrary"),
            vmem_limit_bytes=vmem_limit),
    )(seq_p, e_p, starts, ends)

    out = out[:, :S, :D]
    if span_indices_mask is not None:                  # glue, matches reference
        out = out * span_indices_mask[..., None].astype(out.dtype)
    # NOTE: sequence_mask is accepted but unused, same as the reference forward.
    return out


def _reference(sequence, span_indices, weight, bias):
    """Pure-JAX replica of the PyTorch forward (windowed gather) for verification."""
    starts = span_indices[..., 0]
    ends = span_indices[..., 1]
    widths = ends - starts
    max_w = int(jnp.max(widths)) + 1
    logits = sequence @ weight.T + bias                        # (B, T, 1)
    j = jnp.arange(max_w)[None, None, :]
    span_mask = (j <= widths[..., None]).astype(sequence.dtype)
    raw = ends[..., None] - j
    span_mask = span_mask * (raw >= 0).astype(sequence.dtype)
    idx = jnp.maximum(raw, 0)
    span_emb = jax.vmap(lambda s, i: s[i])(sequence, idx)      # (B, S, W, D)
    span_logits = jax.vmap(lambda l, i: l[i, 0])(logits, idx)  # (B, S, W)
    masked = jnp.where(span_mask > 0, span_logits, jnp.float32(-1000.0))
    wts = jax.nn.softmax(masked, axis=-1)
    return jnp.sum(span_emb * wts[..., None], axis=-2)


if __name__ == "__main__":
    B, T, D, S = 2, 16, 32, 6
    key = jax.random.PRNGKey(0)
    k_seq, k_start, k_len, k_w, k_b = jax.random.split(key, 5)

    sequence = jax.random.normal(k_seq, (B, T, D), dtype=jnp.float32)
    starts = jax.random.randint(k_start, (B, S), 0, T)
    lens = jax.random.randint(k_len, (B, S), 0, 5)
    ends = jnp.minimum(starts + lens, T - 1)
    span_indices = jnp.stack([starts, ends], axis=-1).astype(jnp.int32)

    # Deterministic Linear(input_dim, 1) params (PyTorch-style uniform init bounds).
    bound = 1.0 / math.sqrt(D)
    weight = jax.random.uniform(k_w, (1, D), minval=-bound, maxval=bound,
                                dtype=jnp.float32)
    bias = jax.random.uniform(k_b, (1,), minval=-bound, maxval=bound,
                              dtype=jnp.float32)

    ref = _reference(sequence, span_indices, weight, bias)

    # Default bf16 MXU path (recommended on all generations; softmax math stays f32).
    out_bf16 = self_attentive_span_extractor(sequence, span_indices, weight, bias)
    out_bf16 = jax.block_until_ready(out_bf16)
    assert out_bf16.shape == (B, S, D)
    assert jnp.allclose(out_bf16, ref, atol=3e-2, rtol=3e-2), \
        float(jnp.max(jnp.abs(out_bf16 - ref)))

    # f32 MXU path (exact semantics of the module).
    out_f32 = self_attentive_span_extractor(sequence, span_indices, weight, bias,
                                            matmul_dtype=jnp.float32)
    out_f32 = jax.block_until_ready(out_f32)
    assert out_f32.shape == (B, S, D)
    assert jnp.allclose(out_f32, ref, atol=1e-4, rtol=1e-4), \
        float(jnp.max(jnp.abs(out_f32 - ref)))

    print("KERNEL_OK")
</pallas_src>

<mosaic_0001>
module attributes {stable_mosaic.version = 11 : i64} {
  func.func @_span_extractor_kernel(%arg0: i32, %arg1: i32, %arg2: i32, %arg3: memref<1x128x128xbf16, #tpu.memory_space<vmem>>, %arg4: memref<1x1x128xf32, #tpu.memory_space<vmem>>, %arg5: memref<1x16x1xi32, #tpu.memory_space<vmem>>, %arg6: memref<1x16x1xi32, #tpu.memory_space<vmem>>, %arg7: memref<1x16x128xf32, #tpu.memory_space<vmem>>) attributes {dimension_semantics = [#tpu.dimension_semantics<parallel>, #tpu.dimension_semantics<parallel>, #tpu.dimension_semantics<arbitrary>], iteration_bounds = array<i64: 2, 1, 1>, scalar_prefetch = 0 : i64, scratch_operands = 0 : i64, tpu.core_type = #tpu.core_type<tc>, window_params = [{transform_indices = @transform_0, window_bounds = array<i64: 1, 128, 128>}, {transform_indices = @transform_1, window_bounds = array<i64: 1, 1, 128>}, {transform_indices = @transform_2, window_bounds = array<i64: 1, 16, 1>}, {transform_indices = @transform_3, window_bounds = array<i64: 1, 16, 1>}, {transform_indices = @transform_4, window_bounds = array<i64: 1, 16, 128>}]} {
    %c0 = arith.constant 0 : index
    %c0_0 = arith.constant 0 : index
    %c0_1 = arith.constant 0 : index
    %0 = vector.load %arg4[%c0, %c0_0, %c0_1] : memref<1x1x128xf32, #tpu.memory_space<vmem>>, vector<1x1x128xf32>
    %1 = vector.shape_cast %0 : vector<1x1x128xf32> to vector<1x128xf32>
    %c0_2 = arith.constant 0 : index
    %c0_3 = arith.constant 0 : index
    %c0_4 = arith.constant 0 : index
    %2 = vector.load %arg5[%c0_2, %c0_3, %c0_4] : memref<1x16x1xi32, #tpu.memory_space<vmem>>, vector<1x16x1xi32>
    %3 = vector.shape_cast %2 : vector<1x16x1xi32> to vector<16x1xi32>
    %c0_5 = arith.constant 0 : index
    %c0_6 = arith.constant 0 : index
    %c0_7 = arith.constant 0 : index
    %4 = vector.load %arg6[%c0_5, %c0_6, %c0_7] : memref<1x16x1xi32, #tpu.memory_space<vmem>>, vector<1x16x1xi32>
    %5 = vector.shape_cast %4 : vector<1x16x1xi32> to vector<16x1xi32>
    %6 = tpu.iota {dimensions = array<i32: 1>} : vector<16x128xi32>
    %7 = vector.broadcast %3 : vector<16x1xi32> to vector<16x128xi32>
    %8 = arith.cmpi sge, %6, %7 : vector<16x128xi32>
    %9 = vector.broadcast %5 : vector<16x1xi32> to vector<16x128xi32>
    %10 = arith.cmpi sle, %6, %9 : vector<16x128xi32>
    %11 = arith.andi %8, %10 : vector<16x128xi1>
    %12 = vector.shape_cast %1 : vector<1x128xf32> to vector<1x128xf32>
    %13 = vector.broadcast %12 : vector<1x128xf32> to vector<16x128xf32>
    %cst = arith.constant 0.000000e+00 : f32
    %14 = vector.broadcast %cst : f32 to vector<16x128xf32>
    %15 = arith.select %11, %13, %14 : vector<16x128xi1>, vector<16x128xf32>
    %16 = arith.truncf %15 : vector<16x128xf32> to vector<16x128xbf16>
    %17 = arith.extf %16 : vector<16x128xbf16> to vector<16x128xf32>
    %cst_8 = arith.constant dense<0.000000e+00> : vector<16xf32>
    %18 = vector.multi_reduction <add>, %17, %cst_8 [1] : vector<16x128xf32> to vector<16xf32>
    %19 = vector.shape_cast %18 : vector<16xf32> to vector<16x1xf32>
    %cst_9 = arith.constant 0.000000e+00 : f32
    %20 = vector.broadcast %cst_9 : f32 to vector<16x1xf32>
    %21 = arith.cmpf ogt, %19, %20 : vector<16x1xf32>
    %cst_10 = arith.constant 1.000000e+00 : f32
    %22 = vector.broadcast %cst_10 : f32 to vector<16x1xf32>
    %23 = arith.select %21, %19, %22 : vector<16x1xi1>, vector<16x1xf32>
    %24 = tpu.reciprocal %23 {approx = true} : vector<16x1xf32> -> vector<16x1xf32>
    %25 = arith.mulf %23, %24 : vector<16x1xf32>
    %cst_11 = arith.constant 2.000000e+00 : f32
    %26 = vector.broadcast %cst_11 : f32 to vector<16x1xf32>
    %27 = arith.subf %26, %25 : vector<16x1xf32>
    %28 = arith.mulf %24, %27 : vector<16x1xf32>
    %c0_12 = arith.constant 0 : index
    %c0_13 = arith.constant 0 : index
    %c0_14 = arith.constant 0 : index
    %29 = vector.load %arg3[%c0_12, %c0_13, %c0_14] : memref<1x128x128xbf16, #tpu.memory_space<vmem>>, vector<1x128x128xbf16>
    %30 = vector.shape_cast %29 : vector<1x128x128xbf16> to vector<128x128xbf16>
    %cst_15 = arith.constant dense<0.000000e+00> : vector<16x128xf32>
    %31 = tpu.matmul %16, %30, %cst_15 {dimension_numbers = #tpu.dot_dimension_numbers<[1], [0], [0], [1], [0, 0, 1, 1], [], []>} : vector<16x128xbf16>, vector<128x128xbf16>, vector<16x128xf32> -> vector<16x128xf32>
    %32 = vector.broadcast %28 : vector<16x1xf32> to vector<16x128xf32>
    %33 = arith.mulf %31, %32 : vector<16x128xf32>
    %c0_16 = arith.constant 0 : index
    %c0_17 = arith.constant 0 : index
    %c0_18 = arith.constant 0 : index
    %34 = vector.load %arg7[%c0_16, %c0_17, %c0_18] : memref<1x16x128xf32, #tpu.memory_space<vmem>>, vector<1x16x128xf32>
    %35 = vector.shape_cast %34 : vector<1x16x128xf32> to vector<16x128xf32>
    %36 = vector.shape_cast %33 : vector<16x128xf32> to vector<1x16x128xf32>
    tpu.vector_store %arg7[%c0_16, %c0_17, %c0_18], %36 {strides = array<i32>} : memref<1x16x128xf32, #tpu.memory_space<vmem>>, vector<1x16x128xf32>,
    return
  }
  func.func @transform_0(%arg0: i32, %arg1: i32, %arg2: i32) -> (i32, i32, i32) {
    %c0_i32 = arith.constant 0 : i32
    %c0_i32_0 = arith.constant 0 : i32
    return %arg0, %c0_i32, %arg1 : i32, i32, i32
  }
  func.func @transform_1(%arg0: i32, %arg1: i32, %arg2: i32) -> (i32, i32, i32) {
    %c0_i32 = arith.constant 0 : i32
    %c0_i32_0 = arith.constant 0 : i32
    %c0_i32_1 = arith.constant 0 : i32
    return %arg0, %c0_i32, %c0_i32_0 : i32, i32, i32
  }
  func.func @transform_2(%arg0: i32, %arg1: i32, %arg2: i32) -> (i32, i32, i32) {
    %c0_i32 = arith.constant 0 : i32
    %c0_i32_0 = arith.constant 0 : i32
    return %arg0, %arg2, %c0_i32 : i32, i32, i32
  }
  func.func @transform_3(%arg0: i32, %arg1: i32, %arg2: i32) -> (i32, i32, i32) {
    %c0_i32 = arith.constant 0 : i32
    %c0_i32_0 = arith.constant 0 : i32
    return %arg0, %arg2, %c0_i32 : i32, i32, i32
  }
  func.func @transform_4(%arg0: i32, %arg1: i32, %arg2: i32) -> (i32, i32, i32) {
    %c0_i32 = arith.constant 0 : i32
    return %arg0, %arg2, %arg1 : i32, i32, i32
  }
}

</mosaic_0001>

<bundles_post_ra>
// kernel: tpu_custom_call.1
= control target key start
LH: loop header
LB: loop body
LE: loop exit
PB: predicated region body
PF: predicated region fallthrough
CT: control target
= control target key end

     0   :  { %9 = vsyncpa [#allocation3], 0  ;;  %s1046_s0 = inlined_call_operand.hbm [shape: bf16[2,128,128], index: 0, kind: input, shape index: {}]   ;;  %s1047_s1 = inlined_call_operand.vmem [shape: f32[2,1,128], index: 1, kind: input, shape index: {}]   ;;  %s1048_s2 = inlined_call_operand.vmem [shape: s32[2,16,1], index: 2, kind: input, shape index: {}]   ;;  %s1049_s3 = inlined_call_operand.vmem [shape: s32[2,16,1], index: 3, kind: input, shape index: {}]   ;;  %s1050_s4 = inlined_call_operand.hbm [shape: f32[2,16,128], index: 4, kind: output, shape index: {}]  }
   0x1   :  { %11 = vsyncpa [#allocation3 + $0x1], 0 }
   0x2   :  { %12 = vsyncpa [#allocation4], 0 }
   0x3   :  { %14 = vsyncpa [#allocation4 + $0x1], 0  ;;  %s900_s15 = smov 0   ;;  %s902_s16 = smov 0  }
   0x4   :  { %s904_s17 = smov 0   ;;  %s906_s18 = smov 0  }
   0x5   :  { %s908_s19 = smov 0   ;;  %s910_s20 = smov 0  }
   0x6 LB: > { %s616_s21 = sadd.s32 4294967295, %s868_s20   ;;  %s617_s22 = sadd.s32 4294967294, %s868_s20   ;;  %s868_s20 = sphi %s910_s20, %s20_s20   ;;  %s864_s19 = sphi %s908_s19, %s1059_s19   ;;  %s860_s18 = sphi %s906_s18, %s1058_s18   ;;  %s856_s17 = sphi %s904_s17, %s1057_s17   ;;  %s852_s16 = sphi %s902_s16, %s1056_s16   ;;  %s848_s15 = sphi %s900_s15, %s1055_s15  }
   0x7   : > { %s39_s23 = sadd.s32 1, %s864_s19  ;;  %s48_s24 = sadd.s32 1, %s856_s17 }
   0x8   : > { %p41_p0 = scmp.ge.s32.totalorder %s39_s23, 2  ;;  %p55_p1 = scmp.ne.s32.totalorder %s856_s17, %s852_s16 }
   0x9   : > { %p56_p2 = scmp.eq.s32.totalorder %s868_s20, 0  ;;  %p61_p3 = scmp.ne.s32.totalorder %s852_s16, %s848_s15 }
   0xa   : > { %s1061_s23 = smov (%p41_p0, %s39_s23), 0  ;;  %p62_p5 = scmp.eq.s32.totalorder %s616_s21, 0 }
   0xb   : > { %p941_p4 = por %p56_p2, %p55_p1  ;;  %s43_s26 = ssub.s32 %s864_s19, %s1061_s23 }
   0xc   : > { %p171_p6 = scmp.eq.s32.totalorder %s616_s21, 1  ;;  %p46_p7 = scmp.eq.s32.totalorder %s43_s26, 0 }
   0xd   : > { %p947_p8 = por %p62_p5, %p61_p3  ;;  %p177_p10 = scmp.eq.s32.totalorder %s617_s22, 1 }
   0xe   : > { %p951_p9 = por %p171_p6, %p55_p1  ;;  %p619_p12 = scmp.ge.s32.totalorder %s868_s20, 2 }
   0xf   : > { %s956_s29 = scalar_select %p46_p7, %s856_s17, %s48_s24  }
  0x10   : > { %p958_p11 = por %p177_p10, %p61_p3  ;;  %p694_p13 = scmp.lt.s32.totalorder %s868_s20, 2 }
  0x11   : > { %s197_s5 = sand.u32 1, %s856_s17   ;;  %s670_s7 = sshll.u32 %s864_s19, 6 }
  0x12   : > { %s620_s6 = sshll.u32 %s197_s5, 6  ;;  %s207_s10 = scalar_lea.hbm %s1046_s0, %s670_s7 }
  0x13   : > { %s201_s11 = scalar_lea.vmem [#allocation2], %s620_s6  ;;  %s208_s13 = sshll.u32 %s207_s10, 4  ;;  %s209_s13 = int_to_ptr.hbm [resolvable:$true] %s208_s13 }
  0x14   : > { %s210_s12 = sshll.u32 %s201_s11, 4  ;;  %p687_p0 = pnand %p694_p13, %p941_p4  ;;  %s211_s12 = int_to_ptr.vmem [resolvable:$true] %s210_s12 }
  0x15   : > { %p623_p1 = scmp.ge.s32.totalorder %s868_s20, 1  ;;  %s198_s14 = scalar_lea.sflag [#allocation3], %s197_s5 }
  0x16   : > { %s870_s21 = smov 64   ;;  %s871_s22 = smov 4  }
  0x17   : > { %689 = dma.hbm_to_vmem [thread:$0]  (!%p687_p0), %s209_s13, 1024, %s211_s12, %s198_s14, %s870_s21, %s870_s21, %s871_s22  }
  0x18   : > { %p250_p2 = scmp.lt.s32.totalorder %s868_s20, 3 }
  0x1a   : > { %p251_p3 = pnand %p623_p1, %p250_p2 }
  0x1b   : > { %s974_s24 = sand.u32 (!%p251_p3), 1, %s852_s16  }
  0x1c   : > { %254 = sbr.rel (%p251_p3) target bundleno = 317 (0x13d), region = 36  ;;  %s624_s26 = sshll.u32 (!%p251_p3), %s974_s24, 6 }
  0x1d   : > { %s257_s6 = scalar_lea.sflag (!%p251_p3), [#allocation3], %s974_s24  ;;  %s978_s7 = scalar_lea.vmem (!%p251_p3), [#allocation2], %s624_s26 }
  0x21   : > { %839 = dma.done.wait (%p947_p8), %s257_s6, 1024  }
  0x22   : > { %841 = vsyncadd (%p947_p8), %s257_s6, 4294966272  ;;  %p307_p4 = scmp.lt.s32.totalorder %s860_s18, 1  ;;  %v872_v0 = vmov 0   ;;  %v680_v3 = vld [vmem:[%s978_s7 + $0x38] sm:$0xff]  ;;  %v679_v4 = vld [vmem:[%s978_s7 + $0x30] sm:$0xff]  ;;  %v336_v13 = vlaneseq  ;;  %s625_s22 = sshll.u32 %s974_s24, 4 }
  0x23   : > { %750 = vset.pattern.permute.xlu1 %v872_v0  ;;  %749 = vset.pattern.permute.xlu0 %v872_v0  ;;  %v678_v7 = vld [vmem:[%s978_s7 + $0x28] sm:$0xff]  ;;  %v677_v8 = vld [vmem:[%s978_s7 + $0x20] sm:$0xff]  ;;  %v676_v9 = vld [vmem:[%s978_s7 + $0x18] sm:$0xff]  ;;  %s681_s26 = sshll.u32 %s860_s18, 4  ;;  %s806_s13 = scalar_lea.hbm %s1050_s4, 32 }
  0x24   : > { %s986_s25 = scalar_select %p307_p4, %s860_s18, 1  ;;  %444 = vmatpush.bf16.msra.mxu0 %v680_v3  ;;  %v675_v10 = vld [vmem:[%s978_s7 + $0x10] sm:$0xff]  ;;  %v674_v11 = vld [vmem:[%s978_s7 + $0x8] sm:$0xff]  ;;  %v673_v12 = vld [vmem:[%s978_s7] sm:$0xff]  ;;  %v337_v16 = vand.u32 127, %v336_v13 }
  0x25   : > { %s463_s18 = scalar_lea.sflag [#allocation4], %s974_s24 }
  0x26   : > { %s671_s5 = sshll.u32 %s986_s25, 4  ;;  %s309_s21 = scalar_lea.vmem %s1047_s1, %s986_s25 }
  0x27   : > { %s328_s10 = scalar_lea.vmem %s1049_s3, %s671_s5  ;;  %s318_s12 = scalar_lea.vmem %s1048_s2, %s671_s5  ;;  %v751_v17 = vld [vmem:[%s309_s21] ss:$0 sm:$0xff] }
  0x28   : > { %v334_v1 = vld [vmem:[%s328_s10] sm:$0xff]  ;;  %v335_v5 = vld [vmem:[%s328_s10 + $0x8] sm:$0xff]  ;;  %445 = vmatpush.bf16.msra.mxu0 %v679_v4  ;;  %v663_v20 = vpack.c.bf16 %v751_v17, %v751_v17  ;;  %s477_s25 = scalar_lea.hbm %s1050_s4, %s681_s26  ;;  %s306_s5 = scalar_lea.vmem [#allocation5], %s625_s22 }
  0x29   : > { %v332_v2 = vld [vmem:[%s318_s12] sm:$0xff]  ;;  %347 = vperm.xlu1 %750, %v334_v1   ;;  %v333_v6 = vld [vmem:[%s318_s12 + $0x8] sm:$0xff]  ;;  %s478_s8 = sshll.u32 %s306_s5, 4  ;;  %s480_s9 = sshll.u32 %s477_s25, 4  ;;  %s479_s8 = int_to_ptr.vmem [resolvable:$true] %s478_s8  ;;  %s481_s9 = int_to_ptr.hbm [resolvable:$true] %s480_s9 }
  0x2a   : > { %339 = vperm.xlu0 %749, %v332_v2   ;;  %s800_s10 = sshra.s32 %s481_s9, 4  ;;  %s801_s10 = int_to_ptr.hbm [resolvable:$true] %s800_s10 }
  0x2b   : > { %s802_s27 = scalar_lea.hbm %s801_s10, 16  ;;  %p807_p8 = scmp.lt.s32.totalorder %s801_s10, %s1050_s4 }
  0x2c   : > { %446 = vmatpush.bf16.msra.mxu0 %v678_v7  ;;  %p803_p5 = scmp.ne.s32.totalorder %s801_s10, %s802_s27  ;;  %p808_p10 = scmp.lt.s32.totalorder %s806_s13, %s802_s27 }
  0x2e   : > { %p804_p6 = pnand %p803_p5, %p951_p9  ;;  %p809_p13 = por %p808_p10, %p807_p8 }
  0x30   : > { %447 = vmatpush.bf16.msra.mxu0 %v677_v8  ;;  %p805_p7 = pneg %p804_p6 }
  0x31   : > { %350 = vperm.xlu1 %750, %v335_v5  }
  0x32   : > { %342 = vperm.xlu0 %749, %v333_v6   ;;  %p810_p0 = pnand %p809_p13, %p805_p7 }
  0x34   : > { %448 = vmatpush.bf16.msra.mxu0 %v676_v9 }
  0x38   : > { %449 = vmatpush.bf16.msra.mxu0 %v675_v10 }
  0x3c   : > { %450 = vmatpush.bf16.msra.mxu0 %v674_v11 }
  0x40   : > { %451 = vmatpush.bf16.msra.mxu0 %v673_v12 }
  0x9b   : > { %v348_v14 = vpop.permute.xlu1 %347 }
  0x9c   : > { %v340_v15 = vpop.permute.xlu0 %339  ;;  %vm352_vm0 = vcmp.le.s32.totalorder %v337_v16, %v348_v14 }
  0x9d   : > { %vm344_vm1 = vcmp.ge.s32.totalorder %v337_v16, %v340_v15 }
  0x9e   : > { %vm354_vm2 = vmand %vm344_vm1, %vm352_vm0 }
  0x9f   : > { %v359_v21 = vsel %vm354_vm2, %v751_v17, 0.0 }
  0xa3   : > { %v351_v18 = vpop.permute.xlu1 %350 }
  0xa4   : > { %v343_v19 = vpop.permute.xlu0 %342  ;;  %vm353_vm3 = vcmp.le.s32.totalorder %v337_v16, %v351_v18 }
  0xa5   : > { %vm345_vm4 = vcmp.ge.s32.totalorder %v337_v16, %v343_v19 }
  0xa6   : > { %vm355_vm5 = vmand %vm345_vm4, %vm353_vm3 }
  0xa7   : > { %v360_v22 = vsel %vm355_vm5, %v751_v17, 0.0  ;;  %vm662_vm6 = vmpackc.low %vm355_vm5, %vm354_vm2 }
  0xa8   : > { %664 = vmatmul.msk.bf16.vlgmr.msra.gmra.mxu0 %vm662_vm6, %v663_v20  ;;  %v361_v23 = vpack.c.bf16 %v360_v22, %v359_v21 }
  0xaa   : > { %v362_v24 = vunpack.c.l.bf16 %v361_v23  ;;  %v363_v25 = vunpack.c.h.bf16 %v361_v23 }
  0xac   : > { %364 = vadd.xlane.f32.xlu2 %v362_v24 }
  0xb4   : > { %366 = vadd.xlane.f32.xlu2 %v363_v25 }
 0x11f   : > { %v365_v26 = vpop.xlane.xlu2 %364 }
 0x120   : > { %vm368_vm7 = vcmp.gt.f32.partialorder %v365_v26, 0.0 }
 0x121   : > { %v370_v27 = vsel %vm368_vm7, %v365_v26, 1.0 }
 0x122   : > { %752 = vrcp.f32 %v370_v27 }
 0x125   : > { %v453_v33 = vpop.f32.mrf.mxu0 }
 0x127   : > { %v367_v28 = vpop.xlane.xlu2 %366 }
 0x128   : > { %v753_v29 = vpop.eup %752  ;;  %vm369_vm8 = vcmp.gt.f32.partialorder %v367_v28, 0.0 }
 0x129   : > { %v374_v30 = vmul.f32 %v753_v29, %v370_v27  ;;  %v371_v31 = vsel %vm369_vm8, %v367_v28, 1.0 }
 0x12a   : > { %754 = vrcp.f32 %v371_v31 }
 0x12b   : > { %v376_v32 = vsub.f32 2.0, %v374_v30 }
 0x12d   : > { %v378_v34 = vmul.f32 %v753_v29, %v376_v32  ;;  %v455_v40 = vpop.f32.mrf.mxu0 }
 0x12f   : > { %v458_v35 = vmul.f32 %v453_v33, %v378_v34 }
 0x130   : > { %v755_v36 = vpop.eup %754 }
 0x131   : > { %460 = vst [vmem:[%s306_s5] sm:$0xff] %v458_v35  ;;  %v375_v37 = vmul.f32 %v755_v36, %v371_v31 }
 0x133   : > { %v377_v38 = vsub.f32 2.0, %v375_v37 }
 0x135   : > { %v379_v39 = vmul.f32 %v755_v36, %v377_v38 }
 0x137   : > { %v459_v41 = vmul.f32 %v455_v40, %v379_v39 }
 0x139   : > { %461 = vst [vmem:[%s306_s5 + $0x8] sm:$0xff] %v459_v41 }
 0x13a   : > { %813 = shalt.err (!%p810_p0)
}
 0x13b   : > { %s873_s24 = smov 128   ;;  %s874_s22 = smov 8  }
 0x13c   : > { %684 = dma.vmem_to_hbm [thread:$0]  (%p951_p9), %s479_s8, 256, %s481_s9, %s463_s18, %s873_s24, %s873_s24, %s874_s22  }
 0x13d PF: > { %s495_s26 = sand.u32 1, %s848_s15   ;;  %p691_p1 = pnand %p619_p12, %p958_p11 }
 0x13e   : > { %s496_s6 = scalar_lea.sflag [#allocation4], %s495_s26 }
 0x13f   : > { %p692_p2 = pneg %p691_p1 }
 0x141   : > { %843 = dma.done.wait (%p692_p2), %s496_s6, 256  }
 0x142   : > { %845 = vsyncadd (%p692_p2), %s496_s6, 4294967040  ;;  %s20_s20 = sadd.s32 1, %s868_s20   ;;  %s1055_s15 = smov %s852_s16 }
 0x143   : > { %p17_p3 = scmp.ge.s32.totalorder %s20_s20, 4   ;;  %s1056_s16 = smov %s856_s17 }
 0x144   : > { %s1057_s17 = smov %s956_s29  ;;  %s1058_s18 = smov %s864_s19 }
 0x145   : > { %s1059_s19 = smov %s1061_s23  ;;  %19 = sbr.rel (!%p17_p3) target bundleno = 6 (0x6), region = 90 }
 0x14a   :  { %502 = vsyncpa [#allocation3], 1 }
 0x14b   :  { %504 = vsyncpa [#allocation3 + $0x1], 1 }
 0x14c   :  { %505 = vsyncpa [#allocation4], 1 }
 0x14d   :  { %507 = vsyncpa [#allocation4 + $0x1], 1 }

</bundles_post_ra>
